<compile_context>
chip_gen: v5e
topology: v5e:2x2
jax: 0.10.0
libtpu: 0.0.40
codegen_flags: <defaults>
</compile_context>

<pallas_src>
import jax
import jax.numpy as jnp
from jax.experimental import pallas as pl
from jax.experimental.pallas import tpu as pltpu


def _round_up(x, m):
    return ((x + m - 1) // m) * m


def _dmf_kernel(ue_ref, ie_ref, uid_ref, iid_ref, exp_ref, bias_ref, out_ref):
    # ue_ref:   (Fp, U)  user table^T; row Fp-1 holds gamma, other extra rows 0
    # ie_ref:   (Fp, I)  item table^T; rows >= F are zero
    # uid_ref:  (R, TB)  int32 user ids (lane-dense, sublane-dense)
    # iid_ref:  (R, TB)  int32 item ids
    # exp_ref:  (R, TB)  f32 exposures_hat
    # bias_ref: (1,)     f32 scalar in SMEM
    # out_ref:  (R, TB)  f32 predictions
    Fp, U = ue_ref.shape
    _, I = ie_ref.shape
    R, TB = out_ref.shape

    bias = bias_ref[0]
    ue = ue_ref[...]
    ie = ie_ref[...]
    # Loop-invariant iotas hoisted out of the row loop (JAX does not CSE
    # broadcast_in_dim).
    u_iota = jax.lax.broadcasted_iota(jnp.int32, (U, TB), 0)
    i_iota = jax.lax.broadcasted_iota(jnp.int32, (I, TB), 0)

    def row(r, carry):
        uid = uid_ref[pl.ds(r, 1), :]                        # (1, TB)
        iid = iid_ref[pl.ds(r, 1), :]                        # (1, TB)
        onehot_u = (u_iota == uid).astype(ue.dtype)          # (U, TB)
        onehot_i = (i_iota == iid).astype(ie.dtype)          # (I, TB)

        # In-VMEM gathers as MXU matmuls, f32 accumulate.  theta's last row
        # is gamma_u (gamma folded into the user table); the matching item
        # row is zero so it does not pollute the factor dot product.
        theta = jnp.dot(ue, onehot_u, preferred_element_type=jnp.float32)  # (Fp, TB)
        beta = jnp.dot(ie, onehot_i, preferred_element_type=jnp.float32)   # (Fp, TB)

        gamma_u = theta[Fp - 1:Fp, :]                        # (1, TB)
        dot = jnp.sum(theta * beta, axis=0, keepdims=True)   # (1, TB)

        pred = dot + gamma_u * exp_ref[pl.ds(r, 1), :] + bias
        out_ref[pl.ds(r, 1), :] = pred.astype(out_ref.dtype)
        return carry

    jax.lax.fori_loop(0, R, row, 0, unroll=True)


def prep_dmf_params(user_embeddings, item_embeddings, gamma, bias,
                    table_dtype=jnp.bfloat16):
    """One-time parameter prep (hoisted out of the forward hot path):
    transpose the tables, fold gamma in as the LAST row of the user table,
    zero-pad the factor axis to a multiple of 8 sublanes and cast the tables
    to `table_dtype` (bf16 halves HBM/VMEM; the kernel accumulates in f32)."""
    U, F = user_embeddings.shape
    I, Fi = item_embeddings.shape
    assert F == Fi
    Fp = _round_up(F + 1, 8)

    ue_aug = jnp.zeros((Fp, U), table_dtype)
    ue_aug = ue_aug.at[:F, :].set(user_embeddings.T.astype(table_dtype))
    ue_aug = ue_aug.at[Fp - 1, :].set(gamma.astype(table_dtype))

    ie_aug = jnp.zeros((Fp, I), table_dtype)
    ie_aug = ie_aug.at[:F, :].set(item_embeddings.T.astype(table_dtype))

    bias_s = jnp.asarray(bias, jnp.float32).reshape(1)
    return ue_aug, ie_aug, bias_s


def _choose_tiles(batch, fp):
    # Cap TB so the two (Fp, TB) f32 intermediates stay well under the
    # 64x4KiB vreg file (same on v5e/v6e/v7x).
    if fp <= 64:
        tb_cap = 512
    elif fp <= 128:
        tb_cap = 256
    else:
        tb_cap = 128
    tb = int(min(tb_cap, max(128, pl.next_power_of_2(batch))))
    rows_total = pl.cdiv(batch, tb)
    # Up to 8 sublane-dense rows per grid step, but keep >=2 grid steps when
    # the batch allows it so both v7x TensorCores get work.
    r = int(max(1, min(8, rows_total // 2)))
    return tb, r


def _build_dmf_call(Fp, U, I, G, R, TB, table_dtype, single_buffer_tables):
    table_kwargs = {}
    buffers = 2
    if single_buffer_tables:
        # Constant block index -> tables are fetched once; a single VMEM
        # buffer halves their footprint (critical under v7x's 64 MiB VMEM and
        # v5e's 16 MiB scoped default).
        table_kwargs["pipeline_mode"] = pl.Buffered(1)
        buffers = 1

    table_bytes = (Fp * U + Fp * I) * jnp.dtype(table_dtype).itemsize
    stream_bytes = 2 * 4 * (R * TB * 4)        # double-buffered uid/iid/exp/out
    vmem_limit = int(min(64 * 2**20,
                         max(32 * 2**20,
                             buffers * table_bytes + stream_bytes + (2 << 20))))

    stream_spec = pl.BlockSpec((None, R, TB), lambda i: (i, 0, 0))

    return pl.pallas_call(
        _dmf_kernel,
        out_shape=jax.ShapeDtypeStruct((G, R, TB), jnp.float32),
        grid=(G,),
        in_specs=[
            # Tables: constant block index -> fetched once, VMEM-resident.
            pl.BlockSpec((Fp, U), lambda i: (0, 0), **table_kwargs),
            pl.BlockSpec((Fp, I), lambda i: (0, 0), **table_kwargs),
            # Per-sample streams: (R, TB) sublane- and lane-dense blocks.
            stream_spec,
            stream_spec,
            stream_spec,
            # Scalar bias in SMEM.
            pl.BlockSpec(memory_space=pltpu.MemorySpace.SMEM),
        ],
        out_specs=pl.BlockSpec((None, R, TB), lambda i: (i, 0, 0)),
        compiler_params=pltpu.CompilerParams(
            dimension_semantics=("parallel",),
            vmem_limit_bytes=vmem_limit),
    )


def dmf_forward(params, user_ids, item_ids, exposures_hat):
    """Forward pass using params from prep_dmf_params. Returns (B,) float32."""
    ue_aug, ie_aug, bias_s = params
    Fp, U = ue_aug.shape
    _, I = ie_aug.shape
    B = user_ids.shape[0]

    TB, R = _choose_tiles(B, Fp)
    step = R * TB
    B_pad = pl.cdiv(B, step) * step
    G = B_pad // step
    pad = B_pad - B

    # Padded tail lanes compute with dummy id 0 and are sliced off below.
    uid = jnp.pad(user_ids.astype(jnp.int32), (0, pad)).reshape(G, R, TB)
    iid = jnp.pad(item_ids.astype(jnp.int32), (0, pad)).reshape(G, R, TB)
    exp_rows = jnp.pad(exposures_hat.astype(jnp.float32),
                       (0, pad)).reshape(G, R, TB)

    def run(single_buffer_tables):
        call = _build_dmf_call(Fp, U, I, G, R, TB, ue_aug.dtype,
                               single_buffer_tables)
        return call(ue_aug, ie_aug, uid, iid, exp_rows, bias_s)

    try:
        out = run(True)
    except Exception:
        # Fallback for jax versions without BlockSpec pipeline_mode support:
        # accept default double-buffered tables.
        out = run(False)

    return out.reshape(-1)[:B]


def dmf_reference(user_embeddings, item_embeddings, gamma, bias,
                  user_ids, item_ids, exposures_hat):
    theta_u = user_embeddings[user_ids]
    beta_i = item_embeddings[item_ids]
    gamma_u = gamma[user_ids]
    dot = jnp.sum(theta_u * beta_i, axis=1)
    return dot + gamma_u * exposures_hat + bias[0]


if __name__ == "__main__":
    # Deterministic inputs (matches torch.randn / torch.zeros shapes).
    num_users, num_items, num_factors = 16, 24, 32
    batch = 8

    key = jax.random.PRNGKey(0)
    k_ue, k_ie, k_g, k_uid, k_iid, k_exp = jax.random.split(key, 6)

    user_embeddings = jax.random.normal(k_ue, (num_users, num_factors), jnp.float32)
    item_embeddings = jax.random.normal(k_ie, (num_items, num_factors), jnp.float32)
    gamma = jax.random.normal(k_g, (num_users,), jnp.float32)
    bias = jnp.zeros((1,), jnp.float32)

    user_ids = jax.random.randint(k_uid, (batch,), 0, num_users, jnp.int32)
    item_ids = jax.random.randint(k_iid, (batch,), 0, num_items, jnp.int32)
    exposures_hat = jax.random.uniform(k_exp, (batch,), jnp.float32)

    params = prep_dmf_params(user_embeddings, item_embeddings, gamma, bias)
    pred = dmf_forward(params, user_ids, item_ids, exposures_hat)
    pred = jax.block_until_ready(pred)

    # Reference evaluated at the same bf16 parameter precision the kernel
    # stores its tables in (both accumulate in f32), so tolerance stays tight.
    ue_q = user_embeddings.astype(jnp.bfloat16).astype(jnp.float32)
    ie_q = item_embeddings.astype(jnp.bfloat16).astype(jnp.float32)
    g_q = gamma.astype(jnp.bfloat16).astype(jnp.float32)
    ref = dmf_reference(ue_q, ie_q, g_q, bias,
                        user_ids, item_ids, exposures_hat)

    assert pred.shape == (batch,)
    assert jnp.allclose(pred, ref, atol=1e-4, rtol=1e-4), (pred, ref)
    print("KERNEL_OK")
</pallas_src>

<mosaic_0001>
module attributes {stable_mosaic.version = 11 : i64} {
  func.func @_dmf_kernel(%arg0: i32, %arg1: memref<40x16xbf16, #tpu.memory_space<vmem>>, %arg2: memref<40x24xbf16, #tpu.memory_space<vmem>>, %arg3: memref<1x1x128xi32, #tpu.memory_space<vmem>>, %arg4: memref<1x1x128xi32, #tpu.memory_space<vmem>>, %arg5: memref<1x1x128xf32, #tpu.memory_space<vmem>>, %arg6: memref<1xf32, #tpu.memory_space<smem>>, %arg7: memref<1x1x128xf32, #tpu.memory_space<vmem>>) attributes {dimension_semantics = [#tpu.dimension_semantics<parallel>], iteration_bounds = array<i64: 1>, scalar_prefetch = 0 : i64, scratch_operands = 0 : i64, tpu.core_type = #tpu.core_type<tc>, window_params = [{pipeline_mode = #tpu.pipeline_mode<synchronous>, transform_indices = @transform_0, window_bounds = array<i64: 40, 16>}, {pipeline_mode = #tpu.pipeline_mode<synchronous>, transform_indices = @transform_1, window_bounds = array<i64: 40, 24>}, {transform_indices = @transform_2, window_bounds = array<i64: 1, 1, 128>}, {transform_indices = @transform_3, window_bounds = array<i64: 1, 1, 128>}, {transform_indices = @transform_4, window_bounds = array<i64: 1, 1, 128>}, {transform_indices = @transform_5, window_bounds = array<i64: 1>}, {transform_indices = @transform_6, window_bounds = array<i64: 1, 1, 128>}]} {
    %c0 = arith.constant 0 : index
    %0 = memref.load %arg6[%c0] : memref<1xf32, #tpu.memory_space<smem>>
    %c0_0 = arith.constant 0 : index
    %c0_1 = arith.constant 0 : index
    %1 = vector.load %arg1[%c0_0, %c0_1] : memref<40x16xbf16, #tpu.memory_space<vmem>>, vector<40x16xbf16>
    %c0_2 = arith.constant 0 : index
    %c0_3 = arith.constant 0 : index
    %2 = vector.load %arg2[%c0_2, %c0_3] : memref<40x24xbf16, #tpu.memory_space<vmem>>, vector<40x24xbf16>
    %3 = tpu.iota {dimensions = array<i32: 0>} : vector<16x128xi32>
    %4 = tpu.iota {dimensions = array<i32: 0>} : vector<24x128xi32>
    %c0_i32 = arith.constant 0 : i32
    %c0_4 = arith.constant 0 : index
    %5 = arith.index_cast %c0_i32 : i32 to index
    %c0_5 = arith.constant 0 : index
    %6 = vector.load %arg3[%c0_4, %5, %c0_5] : memref<1x1x128xi32, #tpu.memory_space<vmem>>, vector<1x1x128xi32>
    %7 = vector.shape_cast %6 : vector<1x1x128xi32> to vector<1x128xi32>
    %c0_6 = arith.constant 0 : index
    %8 = arith.index_cast %c0_i32 : i32 to index
    %c0_7 = arith.constant 0 : index
    %9 = vector.load %arg4[%c0_6, %8, %c0_7] : memref<1x1x128xi32, #tpu.memory_space<vmem>>, vector<1x1x128xi32>
    %10 = vector.shape_cast %9 : vector<1x1x128xi32> to vector<1x128xi32>
    %11 = vector.broadcast %7 : vector<1x128xi32> to vector<16x128xi32>
    %12 = arith.cmpi eq, %3, %11 : vector<16x128xi32>
    %13 = arith.extui %12 : vector<16x128xi1> to vector<16x128xi32>
    %14 = arith.sitofp %13 : vector<16x128xi32> to vector<16x128xf32>
    %15 = arith.truncf %14 : vector<16x128xf32> to vector<16x128xbf16>
    %16 = vector.broadcast %10 : vector<1x128xi32> to vector<24x128xi32>
    %17 = arith.cmpi eq, %4, %16 : vector<24x128xi32>
    %18 = arith.extui %17 : vector<24x128xi1> to vector<24x128xi32>
    %19 = arith.sitofp %18 : vector<24x128xi32> to vector<24x128xf32>
    %20 = arith.truncf %19 : vector<24x128xf32> to vector<24x128xbf16>
    %cst = arith.constant dense<0.000000e+00> : vector<40x128xf32>
    %21 = tpu.matmul %1, %15, %cst {dimension_numbers = #tpu.dot_dimension_numbers<[1], [0], [0], [1], [0, 0, 1, 1], [], []>} : vector<40x16xbf16>, vector<16x128xbf16>, vector<40x128xf32> -> vector<40x128xf32>
    %cst_8 = arith.constant dense<0.000000e+00> : vector<40x128xf32>
    %22 = tpu.matmul %2, %20, %cst_8 {dimension_numbers = #tpu.dot_dimension_numbers<[1], [0], [0], [1], [0, 0, 1, 1], [], []>} : vector<40x24xbf16>, vector<24x128xbf16>, vector<40x128xf32> -> vector<40x128xf32>
    %23 = vector.extract_strided_slice %21 {offsets = [39, 0], sizes = [1, 128], strides = [1, 1]} : vector<40x128xf32> to vector<1x128xf32>
    %24 = arith.mulf %21, %22 : vector<40x128xf32>
    %cst_9 = arith.constant dense<0.000000e+00> : vector<128xf32>
    %25 = vector.multi_reduction <add>, %24, %cst_9 [0] : vector<40x128xf32> to vector<128xf32>
    %26 = vector.shape_cast %25 : vector<128xf32> to vector<1x128xf32>
    %c0_10 = arith.constant 0 : index
    %27 = arith.index_cast %c0_i32 : i32 to index
    %c0_11 = arith.constant 0 : index
    %28 = vector.load %arg5[%c0_10, %27, %c0_11] : memref<1x1x128xf32, #tpu.memory_space<vmem>>, vector<1x1x128xf32>
    %29 = vector.shape_cast %28 : vector<1x1x128xf32> to vector<1x128xf32>
    %30 = arith.mulf %23, %29 : vector<1x128xf32>
    %31 = arith.addf %26, %30 : vector<1x128xf32>
    %32 = vector.broadcast %0 : f32 to vector<1x128xf32>
    %33 = arith.addf %31, %32 : vector<1x128xf32>
    %c0_12 = arith.constant 0 : index
    %34 = arith.index_cast %c0_i32 : i32 to index
    %c0_13 = arith.constant 0 : index
    %35 = vector.load %arg7[%c0_12, %34, %c0_13] : memref<1x1x128xf32, #tpu.memory_space<vmem>>, vector<1x1x128xf32>
    %36 = vector.shape_cast %35 : vector<1x1x128xf32> to vector<1x128xf32>
    %37 = vector.shape_cast %33 : vector<1x128xf32> to vector<1x1x128xf32>
    tpu.vector_store %arg7[%c0_12, %34, %c0_13], %37 {strides = array<i32>} : memref<1x1x128xf32, #tpu.memory_space<vmem>>, vector<1x1x128xf32>,
    %c1_i32 = arith.constant 1 : i32
    return
  }
  func.func @transform_0(%arg0: i32) -> (i32, i32) {
    %c0_i32 = arith.constant 0 : i32
    %c0_i32_0 = arith.constant 0 : i32
    %c0_i32_1 = arith.constant 0 : i32
    return %c0_i32, %c0_i32_0 : i32, i32
  }
  func.func @transform_1(%arg0: i32) -> (i32, i32) {
    %c0_i32 = arith.constant 0 : i32
    %c0_i32_0 = arith.constant 0 : i32
    %c0_i32_1 = arith.constant 0 : i32
    return %c0_i32, %c0_i32_0 : i32, i32
  }
  func.func @transform_2(%arg0: i32) -> (i32, i32, i32) {
    %c0_i32 = arith.constant 0 : i32
    %c0_i32_0 = arith.constant 0 : i32
    %c0_i32_1 = arith.constant 0 : i32
    return %arg0, %c0_i32, %c0_i32_0 : i32, i32, i32
  }
  func.func @transform_3(%arg0: i32) -> (i32, i32, i32) {
    %c0_i32 = arith.constant 0 : i32
    %c0_i32_0 = arith.constant 0 : i32
    %c0_i32_1 = arith.constant 0 : i32
    return %arg0, %c0_i32, %c0_i32_0 : i32, i32, i32
  }
  func.func @transform_4(%arg0: i32) -> (i32, i32, i32) {
    %c0_i32 = arith.constant 0 : i32
    %c0_i32_0 = arith.constant 0 : i32
    %c0_i32_1 = arith.constant 0 : i32
    return %arg0, %c0_i32, %c0_i32_0 : i32, i32, i32
  }
  func.func @transform_5(%arg0: i32) -> i32 {
    %c0_i32 = arith.constant 0 : i32
    %c0_i32_0 = arith.constant 0 : i32
    return %c0_i32 : i32
  }
  func.func @transform_6(%arg0: i32) -> (i32, i32, i32) {
    %c0_i32 = arith.constant 0 : i32
    %c0_i32_0 = arith.constant 0 : i32
    %c0_i32_1 = arith.constant 0 : i32
    return %arg0, %c0_i32, %c0_i32_0 : i32, i32, i32
  }
}

module attributes {stable_mosaic.version = 11 : i64} {
  func.func @_dmf_kernel(%arg0: i32, %arg1: memref<40x16xbf16, #tpu.memory_space<vmem>>, %arg2: memref<40x24xbf16, #tpu.memory_space<vmem>>, %arg3: memref<1x1x128xi32, #tpu.memory_space<vmem>>, %arg4: memref<1x1x128xi32, #tpu.memory_space<vmem>>, %arg5: memref<1x1x128xf32, #tpu.memory_space<vmem>>, %arg6: memref<1xf32, #tpu.memory_space<smem>>, %arg7: memref<1x1x128xf32, #tpu.memory_space<vmem>>) attributes {dimension_semantics = [#tpu.dimension_semantics<parallel>], iteration_bounds = array<i64: 1>, scalar_prefetch = 0 : i64, scratch_operands = 0 : i64, tpu.core_type = #tpu.core_type<tc>, window_params = [{pipeline_mode = #tpu.pipeline_mode<synchronous>, transform_indices = @transform_0, window_bounds = array<i64: 40, 16>}, {pipeline_mode = #tpu.pipeline_mode<synchronous>, transform_indices = @transform_1, window_bounds = array<i64: 40, 24>}, {transform_indices = @transform_2, window_bounds = array<i64: 1, 1, 128>}, {transform_indices = @transform_3, window_bounds = array<i64: 1, 1, 128>}, {transform_indices = @transform_4, window_bounds = array<i64: 1, 1, 128>}, {transform_indices = @transform_5, window_bounds = array<i64: 1>}, {transform_indices = @transform_6, window_bounds = array<i64: 1, 1, 128>}]} {
    %c0 = arith.constant 0 : index
    %0 = memref.load %arg6[%c0] : memref<1xf32, #tpu.memory_space<smem>>
    %c0_0 = arith.constant 0 : index
    %c0_1 = arith.constant 0 : index
    %1 = vector.load %arg1[%c0_0, %c0_1] : memref<40x16xbf16, #tpu.memory_space<vmem>>, vector<40x16xbf16>
    %c0_2 = arith.constant 0 : index
    %c0_3 = arith.constant 0 : index
    %2 = vector.load %arg2[%c0_2, %c0_3] : memref<40x24xbf16, #tpu.memory_space<vmem>>, vector<40x24xbf16>
    %3 = tpu.iota {dimensions = array<i32: 0>} : vector<16x128xi32>
    %4 = tpu.iota {dimensions = array<i32: 0>} : vector<24x128xi32>
    %c0_i32 = arith.constant 0 : i32
    %c0_4 = arith.constant 0 : index
    %5 = arith.index_cast %c0_i32 : i32 to index
    %c0_5 = arith.constant 0 : index
    %6 = vector.load %arg3[%c0_4, %5, %c0_5] : memref<1x1x128xi32, #tpu.memory_space<vmem>>, vector<1x1x128xi32>
    %7 = vector.shape_cast %6 : vector<1x1x128xi32> to vector<1x128xi32>
    %c0_6 = arith.constant 0 : index
    %8 = arith.index_cast %c0_i32 : i32 to index
    %c0_7 = arith.constant 0 : index
    %9 = vector.load %arg4[%c0_6, %8, %c0_7] : memref<1x1x128xi32, #tpu.memory_space<vmem>>, vector<1x1x128xi32>
    %10 = vector.shape_cast %9 : vector<1x1x128xi32> to vector<1x128xi32>
    %11 = vector.broadcast %7 : vector<1x128xi32> to vector<16x128xi32>
    %12 = arith.cmpi eq, %3, %11 : vector<16x128xi32>
    %13 = arith.extui %12 : vector<16x128xi1> to vector<16x128xi32>
    %14 = arith.sitofp %13 : vector<16x128xi32> to vector<16x128xf32>
    %15 = arith.truncf %14 : vector<16x128xf32> to vector<16x128xbf16>
    %16 = vector.broadcast %10 : vector<1x128xi32> to vector<24x128xi32>
    %17 = arith.cmpi eq, %4, %16 : vector<24x128xi32>
    %18 = arith.extui %17 : vector<24x128xi1> to vector<24x128xi32>
    %19 = arith.sitofp %18 : vector<24x128xi32> to vector<24x128xf32>
    %20 = arith.truncf %19 : vector<24x128xf32> to vector<24x128xbf16>
    %cst = arith.constant dense<0.000000e+00> : vector<40x128xf32>
    %21 = tpu.matmul %1, %15, %cst {dimension_numbers = #tpu.dot_dimension_numbers<[1], [0], [0], [1], [0, 0, 1, 1], [], []>} : vector<40x16xbf16>, vector<16x128xbf16>, vector<40x128xf32> -> vector<40x128xf32>
    %cst_8 = arith.constant dense<0.000000e+00> : vector<40x128xf32>
    %22 = tpu.matmul %2, %20, %cst_8 {dimension_numbers = #tpu.dot_dimension_numbers<[1], [0], [0], [1], [0, 0, 1, 1], [], []>} : vector<40x24xbf16>, vector<24x128xbf16>, vector<40x128xf32> -> vector<40x128xf32>
    %23 = vector.extract_strided_slice %21 {offsets = [39, 0], sizes = [1, 128], strides = [1, 1]} : vector<40x128xf32> to vector<1x128xf32>
    %24 = arith.mulf %21, %22 : vector<40x128xf32>
    %cst_9 = arith.constant dense<0.000000e+00> : vector<128xf32>
    %25 = vector.multi_reduction <add>, %24, %cst_9 [0] : vector<40x128xf32> to vector<128xf32>
    %26 = vector.shape_cast %25 : vector<128xf32> to vector<1x128xf32>
    %c0_10 = arith.constant 0 : index
    %27 = arith.index_cast %c0_i32 : i32 to index
    %c0_11 = arith.constant 0 : index
    %28 = vector.load %arg5[%c0_10, %27, %c0_11] : memref<1x1x128xf32, #tpu.memory_space<vmem>>, vector<1x1x128xf32>
    %29 = vector.shape_cast %28 : vector<1x1x128xf32> to vector<1x128xf32>
    %30 = arith.mulf %23, %29 : vector<1x128xf32>
    %31 = arith.addf %26, %30 : vector<1x128xf32>
    %32 = vector.broadcast %0 : f32 to vector<1x128xf32>
    %33 = arith.addf %31, %32 : vector<1x128xf32>
    %c0_12 = arith.constant 0 : index
    %34 = arith.index_cast %c0_i32 : i32 to index
    %c0_13 = arith.constant 0 : index
    %35 = vector.load %arg7[%c0_12, %34, %c0_13] : memref<1x1x128xf32, #tpu.memory_space<vmem>>, vector<1x1x128xf32>
    %36 = vector.shape_cast %35 : vector<1x1x128xf32> to vector<1x128xf32>
    %37 = vector.shape_cast %33 : vector<1x128xf32> to vector<1x1x128xf32>
    tpu.vector_store %arg7[%c0_12, %34, %c0_13], %37 {strides = array<i32>} : memref<1x1x128xf32, #tpu.memory_space<vmem>>, vector<1x1x128xf32>,
    %c1_i32 = arith.constant 1 : i32
    return
  }
  func.func @transform_0(%arg0: i32) -> (i32, i32) {
    %c0_i32 = arith.constant 0 : i32
    %c0_i32_0 = arith.constant 0 : i32
    %c0_i32_1 = arith.constant 0 : i32
    return %c0_i32, %c0_i32_0 : i32, i32
  }
  func.func @transform_1(%arg0: i32) -> (i32, i32) {
    %c0_i32 = arith.constant 0 : i32
    %c0_i32_0 = arith.constant 0 : i32
    %c0_i32_1 = arith.constant 0 : i32
    return %c0_i32, %c0_i32_0 : i32, i32
  }
  func.func @transform_2(%arg0: i32) -> (i32, i32, i32) {
    %c0_i32 = arith.constant 0 : i32
    %c0_i32_0 = arith.constant 0 : i32
    %c0_i32_1 = arith.constant 0 : i32
    return %arg0, %c0_i32, %c0_i32_0 : i32, i32, i32
  }
  func.func @transform_3(%arg0: i32) -> (i32, i32, i32) {
    %c0_i32 = arith.constant 0 : i32
    %c0_i32_0 = arith.constant 0 : i32
    %c0_i32_1 = arith.constant 0 : i32
    return %arg0, %c0_i32, %c0_i32_0 : i32, i32, i32
  }
  func.func @transform_4(%arg0: i32) -> (i32, i32, i32) {
    %c0_i32 = arith.constant 0 : i32
    %c0_i32_0 = arith.constant 0 : i32
    %c0_i32_1 = arith.constant 0 : i32
    return %arg0, %c0_i32, %c0_i32_0 : i32, i32, i32
  }
  func.func @transform_5(%arg0: i32) -> i32 {
    %c0_i32 = arith.constant 0 : i32
    %c0_i32_0 = arith.constant 0 : i32
    return %c0_i32 : i32
  }
  func.func @transform_6(%arg0: i32) -> (i32, i32, i32) {
    %c0_i32 = arith.constant 0 : i32
    %c0_i32_0 = arith.constant 0 : i32
    %c0_i32_1 = arith.constant 0 : i32
    return %arg0, %c0_i32, %c0_i32_0 : i32, i32, i32
  }
}

</mosaic_0001>

<bundles_post_ra>
// kernel: tpu_custom_call.1
= control target key start
LH: loop header
LB: loop body
LE: loop exit
PB: predicated region body
PF: predicated region fallthrough
CT: control target
= control target key end

     0   :  { %v37_v0 = vlaneseq  ;;  %s345_s0 = inlined_call_operand.vmem [shape: bf16[40,16], index: 0, kind: input, shape index: {}]   ;;  %s346_s1 = inlined_call_operand.vmem [shape: bf16[40,24], index: 1, kind: input, shape index: {}]   ;;  %s347_s2 = inlined_call_operand.vmem [shape: s32[1,1,128], index: 2, kind: input, shape index: {}]   ;;  %s348_s3 = inlined_call_operand.vmem [shape: s32[1,1,128], index: 3, kind: input, shape index: {}]   ;;  %s349_s4 = inlined_call_operand.vmem [shape: f32[1,1,128], index: 4, kind: input, shape index: {}]   ;;  %s350_s5 = inlined_call_operand.<no memory space> [shape: f32[1], index: 5, kind: input, shape index: {}]   ;;  %s351_s6 = inlined_call_operand.hbm [shape: f32[1,1,128], index: 6, kind: output, shape index: {}]  }
   0x1   :  { %v242_v1 = vld [vmem:[%s347_s2] ss:$0 sm:$0xff] }
   0x2   :  { %v38_v2 = vshrl.u32 %v37_v0, 7  ;;  %v243_v3 = vld [vmem:[%s348_s3] ss:$0 sm:$0xff] }
   0x4   :  { %v39_v4 = vadd.s32 8, %v38_v2  ;;  %vm44_vm0 = vcmp.eq.s32.totalorder %v38_v2, %v242_v1  ;;  %v40_v5 = vadd.s32 16, %v38_v2 }
   0x5   :  { %12 = vsyncpa [#allocation4], 0  ;;  %v230_v6 = vld [vmem:[%s345_s0] sm:$0xff]  ;;  %v231_v7 = vld [vmem:[%s345_s0 + $0x8] sm:$0xff]  ;;  %v271_v8 = vmov 0.0   ;;  %vm132_vm4 = vcmask 1043456   ;;  %vm52_vm6 = vcmp.eq.s32.totalorder %v38_v2, %v243_v3  ;;  %v180_v50 = vstv %s350_s5 }
   0x6   :  { %vm45_vm1 = vcmp.eq.s32.totalorder %v39_v4, %v242_v1  ;;  %vm54_vm2 = vcmp.eq.s32.totalorder %v40_v5, %v243_v3  ;;  %v272_v10 = vmov 1.0|1.0   ;;  %vm76_vm5 = vcmask 130048   ;;  %v36_v12 = vld [vmem:[%s346_s1 + $0x10] sm:$0xf]  ;;  %v233_v15 = vld [vmem:[%s346_s1 + $0x8] sm:$0xff] }
   0x7   :  { %vm212_vm3 = vmpackc.low %vm45_vm1, %vm44_vm0  ;;  %v203_v9 = vsel %vm54_vm2, 1.0, %v271_v8  ;;  %vm53_vm7 = vcmp.eq.s32.totalorder %v39_v4, %v243_v3  ;;  %v118_v14 = vunpack.c.l.b16 %v36_v12  ;;  %vm122_vm9 = vcmask 195584   ;;  %v31_v16 = vld [vmem:[%s345_s0 + $0x10] sm:$0xf]  ;;  %v232_v20 = vld [vmem:[%s346_s1] sm:$0xff]  ;;  %s273_s13 = smov [#allocation3]  }
   0x8   :  { %213 = vmatpush.bf16.msk.msra.mxu0 %vm212_vm3, %v272_v10  ;;  %234 = vmatpush.bf16.msk.msra.mxu3 %vm212_vm3, %v272_v10  ;;  %v62_v11 = vpack.c.bf16 %v203_v9, %v203_v9  ;;  %vm225_vm8 = vmpackc.low %vm53_vm7, %vm52_vm6  ;;  %v72_v18 = vunpack.c.l.b16 %v31_v16  ;;  %v244_v45 = vld [vmem:[%s349_s4] ss:$0 sm:$0xff]  ;;  %s188_s14 = sshll.u32 %s273_s13, 4  ;;  %s190_s17 = sshll.u32 %s351_s6, 4  ;;  %s189_s14 = int_to_ptr.vmem [resolvable:$true] %s188_s14  ;;  %s191_s17 = int_to_ptr.hbm [resolvable:$true] %s190_s17 }
   0x9   :  { %v121_v17 = vpack.c.b16 %v118_v14, %v118_v14 }
   0xa   :  { %v134_v13 = vsel %vm132_vm4, %v62_v11, 0  ;;  %v75_v19 = vpack.c.b16 %v72_v18, %v72_v18 }
   0xb   :  { %214 = vmatmul.msk.bf16.vlgmr.msra.gmra.mxu0 %vm76_vm5, %v230_v6  ;;  %215 = vmatmul.msk.bf16.vlgmr.msra.gmra.mxu3 %vm76_vm5, %v231_v7 }
   0xc   :  { %142 = vmatpush.bf16.msrb.mxu0 %v134_v13  ;;  %235 = vmatpush.bf16.msra.mxu1 %v134_v13 }
   0xd   :  { %236 = vmatpush.bf16.msra.mxu2 %v134_v13 }
  0x10   :  { %237 = vmatpush.bf16.msk.msra.mxu1 %vm225_vm8, %v272_v10  ;;  %226 = vmatpush.bf16.msk.msrb.mxu0 %vm225_vm8, %v272_v10 }
  0x11   :  { %238 = vmatpush.bf16.msk.msra.mxu2 %vm225_vm8, %v272_v10 }
  0x13   :  { %228 = vmatmul.msk.bf16.vlgmr.msra.gmra.mxu1 %vm122_vm9, %v233_v15 }
  0x14   :  { %229 = vmatmul.msk.bf16.vlgmr.msra.gmra.mxu2 %vm122_vm9, %v121_v17 }
  0x1b   :  { %216 = vmatmul.msk.bf16.gmra.mxu3 %vm76_vm5, %v75_v19  ;;  %227 = vmatmul.msk.bf16.vlgmr.msrb.gmra.mxu0 %vm122_vm9, %v232_v20 }
  0x88   :  { %v95_v21 = vpop.f32.mrf.mxu0 }
  0x8e   :  { %v100_v22 = vpop.f32.mrf.mxu3 }
  0x90   :  { %v97_v23 = vpop.f32.mrf.mxu0  ;;  %v150_v26 = vpop.f32.mrf.mxu1 }
  0x91   :  { %v161_v34 = vmul.f32 %v150_v26, %v100_v22 }
  0x96   :  { %v102_v24 = vpop.f32.mrf.mxu3 }
  0x97   :  { %v155_v25 = vpop.f32.mrf.mxu2 }
  0x98   :  { %v145_v27 = vpop.f32.mrf.mxu0  ;;  %v152_v33 = vpop.f32.mrf.mxu1 }
  0x99   :  { %v159_v31 = vmul.f32 %v145_v27, %v95_v21  ;;  %v162_v36 = vmul.f32 %v152_v33, %v102_v24 }
  0x9e   :  { %v105_v28 = vpop.f32.mrf.mxu3 }
  0x9f   :  { %v157_v29 = vpop.f32.mrf.mxu2  ;;  %v163_v37 = vmul.f32 %v155_v25, %v105_v28  ;;  %v178_v48 = vmul.f32 %v244_v45, %v105_v28 }
  0xa0   :  { %v147_v30 = vpop.f32.mrf.mxu0 }
  0xa1   :  { %v160_v32 = vmul.f32 %v147_v30, %v97_v23 }
  0xa3   :  { %v164_v35 = vadd.f32 %v160_v32, %v159_v31 }
  0xa5   :  { %v165_v38 = vadd.f32 %v164_v35, %v161_v34 }
  0xa6   :  { %v107_v39 = vpop.f32.mrf.mxu3 }
  0xa7   :  { %v166_v40 = vadd.f32 %v165_v38, %v162_v36 }
  0xa9   :  { %v167_v41 = vadd.f32 %v166_v40, %v163_v37 }
  0xab   :  { %v168_v42 = vrot.slane %v167_v41, 4 }
  0xad   :  { %v169_v43 = vadd.f32 %v168_v42, %v167_v41 }
  0xaf   :  { %v170_v44 = vrot.slane %v169_v43, 2 }
  0xb1   :  { %v171_v46 = vadd.f32 %v170_v44, %v169_v43 }
  0xb3   :  { %v172_v47 = vrot.slane %v171_v46, 1 }
  0xb5   :  { %v173_v49 = vadd.f32 %v172_v47, %v171_v46 }
  0xb7   :  { %v179_v51 = vadd.f32 %v178_v48, %v173_v49 }
  0xb9   :  { %v181_v52 = vadd.f32 %v180_v50, %v179_v51 }
  0xbb   :  { %182 = vst [vmem:[#allocation3 - $0x7] sm:$0x80] %v181_v52 }
  0xbc   :  { %193 = dma.vmem_to_hbm [thread:$0]  %s189_s14, 16, %s191_s17, [#allocation4]  }
  0xbd   :  { %269 = dma.done.wait [#allocation4], 16  }
  0xbe   :  { %270 = vsyncadd [#allocation4], 4294967280 }
  0xbf   :  { %198 = vsyncpa [#allocation4], 1 }

// kernel: tpu_custom_call.1
= control target key start
LH: loop header
LB: loop body
LE: loop exit
PB: predicated region body
PF: predicated region fallthrough
CT: control target
= control target key end

     0   :  { %v37_v0 = vlaneseq  ;;  %s345_s0 = inlined_call_operand.vmem [shape: bf16[40,16], index: 0, kind: input, shape index: {}]   ;;  %s346_s1 = inlined_call_operand.vmem [shape: bf16[40,24], index: 1, kind: input, shape index: {}]   ;;  %s347_s2 = inlined_call_operand.vmem [shape: s32[1,1,128], index: 2, kind: input, shape index: {}]   ;;  %s348_s3 = inlined_call_operand.vmem [shape: s32[1,1,128], index: 3, kind: input, shape index: {}]   ;;  %s349_s4 = inlined_call_operand.vmem [shape: f32[1,1,128], index: 4, kind: input, shape index: {}]   ;;  %s350_s5 = inlined_call_operand.<no memory space> [shape: f32[1], index: 5, kind: input, shape index: {}]   ;;  %s351_s6 = inlined_call_operand.hbm [shape: f32[1,1,128], index: 6, kind: output, shape index: {}]  }
   0x1   :  { %v242_v1 = vld [vmem:[%s347_s2] ss:$0 sm:$0xff] }
   0x2   :  { %v38_v2 = vshrl.u32 %v37_v0, 7  ;;  %v243_v3 = vld [vmem:[%s348_s3] ss:$0 sm:$0xff] }
   0x4   :  { %v39_v4 = vadd.s32 8, %v38_v2  ;;  %vm44_vm0 = vcmp.eq.s32.totalorder %v38_v2, %v242_v1  ;;  %v40_v5 = vadd.s32 16, %v38_v2 }
   0x5   :  { %12 = vsyncpa [#allocation4], 0  ;;  %v230_v6 = vld [vmem:[%s345_s0] sm:$0xff]  ;;  %v231_v7 = vld [vmem:[%s345_s0 + $0x8] sm:$0xff]  ;;  %v271_v8 = vmov 0.0   ;;  %vm132_vm4 = vcmask 1043456   ;;  %vm52_vm6 = vcmp.eq.s32.totalorder %v38_v2, %v243_v3  ;;  %v180_v50 = vstv %s350_s5 }
   0x6   :  { %vm45_vm1 = vcmp.eq.s32.totalorder %v39_v4, %v242_v1  ;;  %vm54_vm2 = vcmp.eq.s32.totalorder %v40_v5, %v243_v3  ;;  %v272_v10 = vmov 1.0|1.0   ;;  %vm76_vm5 = vcmask 130048   ;;  %v36_v12 = vld [vmem:[%s346_s1 + $0x10] sm:$0xf]  ;;  %v233_v15 = vld [vmem:[%s346_s1 + $0x8] sm:$0xff] }
   0x7   :  { %vm212_vm3 = vmpackc.low %vm45_vm1, %vm44_vm0  ;;  %v203_v9 = vsel %vm54_vm2, 1.0, %v271_v8  ;;  %vm53_vm7 = vcmp.eq.s32.totalorder %v39_v4, %v243_v3  ;;  %v118_v14 = vunpack.c.l.b16 %v36_v12  ;;  %vm122_vm9 = vcmask 195584   ;;  %v31_v16 = vld [vmem:[%s345_s0 + $0x10] sm:$0xf]  ;;  %v232_v20 = vld [vmem:[%s346_s1] sm:$0xff]  ;;  %s273_s13 = smov [#allocation3]  }
   0x8   :  { %213 = vmatpush.bf16.msk.msra.mxu0 %vm212_vm3, %v272_v10  ;;  %234 = vmatpush.bf16.msk.msra.mxu3 %vm212_vm3, %v272_v10  ;;  %v62_v11 = vpack.c.bf16 %v203_v9, %v203_v9  ;;  %vm225_vm8 = vmpackc.low %vm53_vm7, %vm52_vm6  ;;  %v72_v18 = vunpack.c.l.b16 %v31_v16  ;;  %v244_v45 = vld [vmem:[%s349_s4] ss:$0 sm:$0xff]  ;;  %s188_s14 = sshll.u32 %s273_s13, 4  ;;  %s190_s17 = sshll.u32 %s351_s6, 4  ;;  %s189_s14 = int_to_ptr.vmem [resolvable:$true] %s188_s14  ;;  %s191_s17 = int_to_ptr.hbm [resolvable:$true] %s190_s17 }
   0x9   :  { %v121_v17 = vpack.c.b16 %v118_v14, %v118_v14 }
   0xa   :  { %v134_v13 = vsel %vm132_vm4, %v62_v11, 0  ;;  %v75_v19 = vpack.c.b16 %v72_v18, %v72_v18 }
   0xb   :  { %214 = vmatmul.msk.bf16.vlgmr.msra.gmra.mxu0 %vm76_vm5, %v230_v6  ;;  %215 = vmatmul.msk.bf16.vlgmr.msra.gmra.mxu3 %vm76_vm5, %v231_v7 }
   0xc   :  { %142 = vmatpush.bf16.msrb.mxu0 %v134_v13  ;;  %235 = vmatpush.bf16.msra.mxu1 %v134_v13 }
   0xd   :  { %236 = vmatpush.bf16.msra.mxu2 %v134_v13 }
  0x10   :  { %237 = vmatpush.bf16.msk.msra.mxu1 %vm225_vm8, %v272_v10  ;;  %226 = vmatpush.bf16.msk.msrb.mxu0 %vm225_vm8, %v272_v10 }
  0x11   :  { %238 = vmatpush.bf16.msk.msra.mxu2 %vm225_vm8, %v272_v10 }
  0x13   :  { %228 = vmatmul.msk.bf16.vlgmr.msra.gmra.mxu1 %vm122_vm9, %v233_v15 }
  0x14   :  { %229 = vmatmul.msk.bf16.vlgmr.msra.gmra.mxu2 %vm122_vm9, %v121_v17 }
  0x1b   :  { %216 = vmatmul.msk.bf16.gmra.mxu3 %vm76_vm5, %v75_v19  ;;  %227 = vmatmul.msk.bf16.vlgmr.msrb.gmra.mxu0 %vm122_vm9, %v232_v20 }
  0x88   :  { %v95_v21 = vpop.f32.mrf.mxu0 }
  0x8e   :  { %v100_v22 = vpop.f32.mrf.mxu3 }
  0x90   :  { %v97_v23 = vpop.f32.mrf.mxu0  ;;  %v150_v26 = vpop.f32.mrf.mxu1 }
  0x91   :  { %v161_v34 = vmul.f32 %v150_v26, %v100_v22 }
  0x96   :  { %v102_v24 = vpop.f32.mrf.mxu3 }
  0x97   :  { %v155_v25 = vpop.f32.mrf.mxu2 }
  0x98   :  { %v145_v27 = vpop.f32.mrf.mxu0  ;;  %v152_v33 = vpop.f32.mrf.mxu1 }
  0x99   :  { %v159_v31 = vmul.f32 %v145_v27, %v95_v21  ;;  %v162_v36 = vmul.f32 %v152_v33, %v102_v24 }
  0x9e   :  { %v105_v28 = vpop.f32.mrf.mxu3 }
  0x9f   :  { %v157_v29 = vpop.f32.mrf.mxu2  ;;  %v163_v37 = vmul.f32 %v155_v25, %v105_v28  ;;  %v178_v48 = vmul.f32 %v244_v45, %v105_v28 }
  0xa0   :  { %v147_v30 = vpop.f32.mrf.mxu0 }
  0xa1   :  { %v160_v32 = vmul.f32 %v147_v30, %v97_v23 }
  0xa3   :  { %v164_v35 = vadd.f32 %v160_v32, %v159_v31 }
  0xa5   :  { %v165_v38 = vadd.f32 %v164_v35, %v161_v34 }
  0xa6   :  { %v107_v39 = vpop.f32.mrf.mxu3 }
  0xa7   :  { %v166_v40 = vadd.f32 %v165_v38, %v162_v36 }
  0xa9   :  { %v167_v41 = vadd.f32 %v166_v40, %v163_v37 }
  0xab   :  { %v168_v42 = vrot.slane %v167_v41, 4 }
  0xad   :  { %v169_v43 = vadd.f32 %v168_v42, %v167_v41 }
  0xaf   :  { %v170_v44 = vrot.slane %v169_v43, 2 }
  0xb1   :  { %v171_v46 = vadd.f32 %v170_v44, %v169_v43 }
  0xb3   :  { %v172_v47 = vrot.slane %v171_v46, 1 }
  0xb5   :  { %v173_v49 = vadd.f32 %v172_v47, %v171_v46 }
  0xb7   :  { %v179_v51 = vadd.f32 %v178_v48, %v173_v49 }
  0xb9   :  { %v181_v52 = vadd.f32 %v180_v50, %v179_v51 }
  0xbb   :  { %182 = vst [vmem:[#allocation3 - $0x7] sm:$0x80] %v181_v52 }
  0xbc   :  { %193 = dma.vmem_to_hbm [thread:$0]  %s189_s14, 16, %s191_s17, [#allocation4]  }
  0xbd   :  { %269 = dma.done.wait [#allocation4], 16  }
  0xbe   :  { %270 = vsyncadd [#allocation4], 4294967280 }
  0xbf   :  { %198 = vsyncpa [#allocation4], 1 }

</bundles_post_ra>
